<compile_context>
chip_gen: v5e
topology: v5e:2x2
jax: 0.10.0
libtpu: 0.0.40
codegen_flags: <defaults>
</compile_context>

<pallas_src>
import functools

import jax
import jax.numpy as jnp
from jax.experimental import pallas as pl
from jax.experimental.pallas import tpu as pltpu


def _round_up(x, m):
    return (x + m - 1) // m * m


def _vmem_capacity_bytes():
    """Per-core VMEM capacity, queried at trace time; conservative fallback if unavailable."""
    try:
        info = pltpu.get_tpu_info()
        for name in ("vmem_capacity_bytes", "vmem_bytes", "vmem_size_bytes"):
            v = getattr(info, name, None)
            if v:
                return int(v)
    except Exception:
        pass
    return 64 * 1024 * 1024  # v7x per-TC size: a safe lower bound on every TPU generation


def _const_block_spec(block_shape, index_map):
    """BlockSpec for a constant-index (resident) operand; single-buffered when supported."""
    try:
        return pl.BlockSpec(block_shape, index_map, pipeline_mode=pl.Buffered(1))
    except (TypeError, AttributeError):
        return pl.BlockSpec(block_shape, index_map)


def _erf(x):
    # Abramowitz & Stegun 7.1.26 rational approximation (|err| <= 1.5e-7 in f32).
    # Uses only mul/add/div/exp/select, so it lowers on any Mosaic version; exp lands on the
    # EUP slot and the Horner polynomial on the VALU.
    p = 0.3275911
    a1, a2, a3, a4, a5 = 0.254829592, -0.284496736, 1.421413741, -1.453152027, 1.061405429
    ax = jnp.abs(x)
    t = 1.0 / (1.0 + p * ax)
    poly = ((((a5 * t + a4) * t + a3) * t + a2) * t + a1) * t
    y = 1.0 - poly * jnp.exp(-(ax * ax))
    return jnp.where(x < 0, -y, y)


def _gelu_exact(x):
    # HF ACT2FN['gelu'] == exact (erf-based) GELU.
    return 0.5 * x * (1.0 + _erf(x * 0.7071067811865476))


def _projector_kernel(x_ref, w1_ref, b1_ref, w2_ref, b2_ref, o_ref, h_ref):
    # Grid: (i over row tiles [parallel], j over linear_2 output-column tiles [arbitrary]).
    # h_ref (VMEM scratch) persists across j: GELU(x @ W1 + b1) is computed once per row tile
    # (at j == 0) and reused for every output-column tile of linear_2.
    @pl.when(pl.program_id(1) == 0)
    def _():
        h = jnp.dot(x_ref[...], w1_ref[...], preferred_element_type=jnp.float32)
        h = h + b1_ref[...].astype(jnp.float32)
        # GELU in the compute dtype: packed VALU ops shrink the un-hidden activation phase
        # between the two matmuls (bf16 default); in the f32 path this is exact f32 math.
        h_ref[...] = _gelu_exact(h.astype(h_ref.dtype))

    o = jnp.dot(h_ref[...], w2_ref[...], preferred_element_type=jnp.float32)
    o = o + b2_ref[...].astype(jnp.float32)
    o_ref[...] = o.astype(o_ref.dtype)


def _choose_tiling(m, d_in_p, d_text_p, csz, osz, row_align, tm_hint, tn_hint, vmem_budget):
    """Pick (tm, tn, w2_resident, vmem_need_bytes).

    Prefers a fully VMEM-resident W2 (removes the per-row-tile HBM re-stream of d_text^2 weights,
    the main roofline risk on v5e/v6e); otherwise column-tiles W2 while keeping the row tile large
    (64 MiB-VMEM parts such as v7x)."""

    def need(tm, tn, resident):
        w2_bytes = d_text_p * d_text_p * csz if resident else 2 * d_text_p * tn * csz
        b2_bytes = d_text_p * 4 if resident else 2 * tn * 4
        return (2 * tm * d_in_p * csz        # x row tiles (double-buffered)
                + d_in_p * d_text_p * csz    # W1 (constant index, single-buffered)
                + d_text_p * 4               # b1 (f32, single-buffered)
                + w2_bytes + b2_bytes
                + 2 * tm * tn * osz          # output tiles (double-buffered)
                + tm * d_text_p * csz)       # h scratch

    tm = min(tm_hint, _round_up(m, row_align))
    # Megacore guard: keep >= 2 row tiles when possible so both TensorCores (v7x) get work.
    if _round_up(m, tm) // tm < 2 and m > row_align:
        tm = _round_up(-(-m // 2), row_align)

    if need(tm, d_text_p, True) <= vmem_budget:
        return tm, d_text_p, True, need(tm, d_text_p, True)

    # Column-tiled W2: largest 128-multiple divisor of d_text_p that fits (<= tn_hint).
    tn = 128
    for cand in range(128, d_text_p + 1, 128):
        if d_text_p % cand == 0 and cand <= tn_hint and need(tm, cand, False) <= vmem_budget:
            tn = cand
    while need(tm, tn, False) > vmem_budget and tm > row_align:
        tm = max(row_align, _round_up(tm // 2, row_align))
    return tm, tn, False, need(tm, tn, False)


def prepare_audio_projector_params(w1, b1, w2, b2, compute_dtype=jnp.bfloat16):
    """Pad feature dims to multiples of 128 (lane-dense DMAs, no masked stores) and cast weights
    to the compute dtype ONCE, outside the per-call hot path (weights are reused across calls)."""
    d_in, d_text = w1.shape
    d_in_p = _round_up(d_in, 128)
    d_text_p = _round_up(d_text, 128)
    w1_p = jnp.pad(w1, ((0, d_in_p - d_in), (0, d_text_p - d_text))).astype(compute_dtype)
    w2_p = jnp.pad(w2, ((0, d_text_p - d_text), (0, d_text_p - d_text))).astype(compute_dtype)
    b1_p = jnp.pad(b1, (0, d_text_p - d_text)).astype(jnp.float32).reshape(1, d_text_p)
    b2_p = jnp.pad(b2, (0, d_text_p - d_text)).astype(jnp.float32).reshape(1, d_text_p)
    return w1_p, b1_p, w2_p, b2_p


@functools.partial(jax.jit, static_argnames=("d_text", "tm", "tn", "compute_dtype"))
def audio_projector_prepadded(x, w1_p, b1_p, w2_p, b2_p, *, d_text, tm=512, tn=1024,
                              compute_dtype=jnp.bfloat16):
    """x: (batch, seq, d_audio).  w1_p/b1_p/w2_p/b2_p come from prepare_audio_projector_params
    (weights pre-transposed to (in, out) layout vs. PyTorch's (out, in))."""
    batch, seq, d_in = x.shape
    d_in_p, d_text_p = w1_p.shape
    out_dtype = x.dtype
    csz = jnp.dtype(compute_dtype).itemsize
    osz = jnp.dtype(out_dtype).itemsize
    # Native sublane packing: 16-row multiples for bf16, 32 for 8-bit, 8 for f32.
    row_align = 8 * max(1, 4 // csz)

    m = batch * seq
    vmem_cap = _vmem_capacity_bytes()
    vmem_budget = int(vmem_cap * 0.82)   # leave compiler spill / internal-scratch headroom

    tm_eff, tn_eff, w2_resident, vmem_need = _choose_tiling(
        m, d_in_p, d_text_p, csz, osz, row_align, tm, tn, vmem_budget)
    m_p = _round_up(m, tm_eff)
    grid = (m_p // tm_eff, d_text_p // tn_eff)

    x2d = jnp.pad(x.reshape(m, d_in),
                  ((0, m_p - m), (0, d_in_p - d_in))).astype(compute_dtype)

    if w2_resident:
        w2_spec = _const_block_spec((d_text_p, d_text_p), lambda i, j: (0, 0))
        b2_spec = _const_block_spec((1, d_text_p), lambda i, j: (0, 0))
    else:
        w2_spec = pl.BlockSpec((d_text_p, tn_eff), lambda i, j: (0, j))
        b2_spec = pl.BlockSpec((1, tn_eff), lambda i, j: (0, j))

    vmem_limit = int(min(max(vmem_need * 1.3, 32 * 1024 * 1024), vmem_cap * 0.9))
    vmem_limit = int(max(vmem_limit, vmem_need + (2 << 20)))

    w2_reads = 1 if w2_resident else grid[0]   # column-tiled W2 is re-streamed once per row tile
    cost = pl.CostEstimate(
        flops=2 * m_p * d_text_p * (d_in_p + d_text_p),
        transcendentals=m_p * d_text_p,   # exp inside the erf-GELU
        bytes_accessed=(m_p * d_in_p + d_in_p * d_text_p
                        + w2_reads * d_text_p * d_text_p) * csz
        + 2 * d_text_p * 4
        + m_p * d_text_p * osz,
    )

    out2d = pl.pallas_call(
        _projector_kernel,
        out_shape=jax.ShapeDtypeStruct((m_p, d_text_p), out_dtype),
        grid_spec=pltpu.PrefetchScalarGridSpec(
            num_scalar_prefetch=0,
            grid=grid,
            in_specs=[
                pl.BlockSpec((tm_eff, d_in_p), lambda i, j: (i, 0)),        # x row tile
                _const_block_spec((d_in_p, d_text_p), lambda i, j: (0, 0)),  # W1 (resident)
                _const_block_spec((1, d_text_p), lambda i, j: (0, 0)),       # b1 (resident)
                w2_spec,                                                     # W2
                b2_spec,                                                     # b2
            ],
            out_specs=pl.BlockSpec((tm_eff, tn_eff), lambda i, j: (i, j)),
            scratch_shapes=[pltpu.VMEM((tm_eff, d_text_p), compute_dtype)],
        ),
        compiler_params=pltpu.CompilerParams(
            # The j axis reuses the h scratch written at j == 0, so it must stay sequential;
            # the row axis carries the megacore parallelism.
            dimension_semantics=("parallel", "arbitrary"),
            vmem_limit_bytes=vmem_limit,
        ),
        cost_estimate=cost,
    )(x2d, w1_p, b1_p, w2_p, b2_p)

    return out2d[:m, :d_text].reshape(batch, seq, d_text)


def audio_projector(x, w1, b1, w2, b2, *, tm=512, tn=1024, compute_dtype=jnp.bfloat16):
    """Convenience wrapper: prepares (pads/casts) the weights and runs the projector."""
    w1_p, b1_p, w2_p, b2_p = prepare_audio_projector_params(w1, b1, w2, b2, compute_dtype)
    return audio_projector_prepadded(x, w1_p, b1_p, w2_p, b2_p, d_text=w1.shape[1],
                                     tm=tm, tn=tn, compute_dtype=compute_dtype)


def _reference(x, w1, b1, w2, b2):
    h = jnp.einsum("bsd,de->bse", x, w1) + b1
    h = jax.nn.gelu(h, approximate=False)
    return jnp.einsum("bsd,de->bse", h, w2) + b2


if __name__ == "__main__":
    # Small shapes consistent with the module's forward:
    #   audio_config.hidden_size = 32, text_config.hidden_size = 32, (batch, seq) = (2, 8).
    batch, seq = 2, 8
    d_audio, d_text = 32, 32

    key = jax.random.PRNGKey(0)
    kx, kw1, kb1, kw2, kb2 = jax.random.split(key, 5)

    x = jax.random.normal(kx, (batch, seq, d_audio), dtype=jnp.float32)
    # PyTorch nn.Linear stores weights as (out, in); here they are pre-transposed to (in, out).
    w1 = jax.random.normal(kw1, (d_audio, d_text), dtype=jnp.float32) * (1.0 / jnp.sqrt(d_audio))
    b1 = jax.random.normal(kb1, (d_text,), dtype=jnp.float32) * 0.01
    w2 = jax.random.normal(kw2, (d_text, d_text), dtype=jnp.float32) * (1.0 / jnp.sqrt(d_text))
    b2 = jax.random.normal(kb2, (d_text,), dtype=jnp.float32) * 0.01

    ref = _reference(x, w1, b1, w2, b2)

    # Full-precision path: tight check against the f32 reference.
    out_f32 = jax.block_until_ready(audio_projector(x, w1, b1, w2, b2, compute_dtype=jnp.float32))
    assert out_f32.shape == (batch, seq, d_text)
    assert jnp.allclose(out_f32, ref, atol=1e-5, rtol=1e-5), "f32 mismatch vs reference"

    # Default mixed-precision path (bf16 operands + bf16 GELU, f32 accumulation): loose tolerance
    # reflecting bf16 rounding of x/W/h and the bf16 activation evaluation.
    out_bf16 = jax.block_until_ready(audio_projector(x, w1, b1, w2, b2))
    assert out_bf16.shape == (batch, seq, d_text)
    assert jnp.allclose(out_bf16, ref, atol=0.15, rtol=0.15), "bf16 mismatch vs reference"

    print("KERNEL_OK")
</pallas_src>

<mosaic_0001>
module attributes {stable_mosaic.version = 11 : i64} {
  func.func @_projector_kernel(%arg0: i32, %arg1: i32, %arg2: memref<8x128xf32, #tpu.memory_space<vmem>>, %arg3: memref<128x128xf32, #tpu.memory_space<vmem>>, %arg4: memref<1x128xf32, #tpu.memory_space<vmem>>, %arg5: memref<128x128xf32, #tpu.memory_space<vmem>>, %arg6: memref<1x128xf32, #tpu.memory_space<vmem>>, %arg7: memref<8x128xf32, #tpu.memory_space<vmem>>, %arg8: memref<8x128xf32, #tpu.memory_space<vmem>>) attributes {dimension_semantics = [#tpu.dimension_semantics<parallel>, #tpu.dimension_semantics<arbitrary>], iteration_bounds = array<i64: 2, 1>, scalar_prefetch = 0 : i64, scratch_operands = 1 : i64, tpu.core_type = #tpu.core_type<tc>, window_params = [{transform_indices = @transform_0, window_bounds = array<i64: 8, 128>}, {pipeline_mode = #tpu.pipeline_mode<synchronous>, transform_indices = @transform_1, window_bounds = array<i64: 128, 128>}, {pipeline_mode = #tpu.pipeline_mode<synchronous>, transform_indices = @transform_2, window_bounds = array<i64: 1, 128>}, {pipeline_mode = #tpu.pipeline_mode<synchronous>, transform_indices = @transform_3, window_bounds = array<i64: 128, 128>}, {pipeline_mode = #tpu.pipeline_mode<synchronous>, transform_indices = @transform_4, window_bounds = array<i64: 1, 128>}, {transform_indices = @transform_5, window_bounds = array<i64: 8, 128>}]} {
    %c0_i32 = arith.constant 0 : i32
    %0 = arith.cmpi eq, %arg1, %c0_i32 : i32
    %1 = arith.extui %0 : i1 to i32
    %c0_i32_0 = arith.constant 0 : i32
    %2 = arith.cmpi ne, %1, %c0_i32_0 : i32
    scf.if %2 {
      %c0_8 = arith.constant 0 : index
      %c0_9 = arith.constant 0 : index
      %10 = vector.load %arg2[%c0_8, %c0_9] : memref<8x128xf32, #tpu.memory_space<vmem>>, vector<8x128xf32>
      %c0_10 = arith.constant 0 : index
      %c0_11 = arith.constant 0 : index
      %11 = vector.load %arg3[%c0_10, %c0_11] : memref<128x128xf32, #tpu.memory_space<vmem>>, vector<128x128xf32>
      %cst_12 = arith.constant dense<0.000000e+00> : vector<8x128xf32>
      %12 = tpu.matmul %10, %11, %cst_12 {dimension_numbers = #tpu.dot_dimension_numbers<[1], [0], [0], [1], [0, 0, 1, 1], [], []>} : vector<8x128xf32>, vector<128x128xf32>, vector<8x128xf32> -> vector<8x128xf32>
      %c0_13 = arith.constant 0 : index
      %c0_14 = arith.constant 0 : index
      %13 = vector.load %arg4[%c0_13, %c0_14] : memref<1x128xf32, #tpu.memory_space<vmem>>, vector<1x128xf32>
      %14 = vector.broadcast %13 : vector<1x128xf32> to vector<8x128xf32>
      %15 = arith.addf %12, %14 : vector<8x128xf32>
      %cst_15 = arith.constant 5.000000e-01 : f32
      %16 = vector.broadcast %cst_15 : f32 to vector<8x128xf32>
      %17 = arith.mulf %16, %15 : vector<8x128xf32>
      %cst_16 = arith.constant 0.707106769 : f32
      %18 = vector.broadcast %cst_16 : f32 to vector<8x128xf32>
      %19 = arith.mulf %15, %18 : vector<8x128xf32>
      %20 = math.absf %19 : vector<8x128xf32>
      %cst_17 = arith.constant 0.327591091 : f32
      %21 = vector.broadcast %cst_17 : f32 to vector<8x128xf32>
      %22 = arith.mulf %21, %20 : vector<8x128xf32>
      %cst_18 = arith.constant 1.000000e+00 : f32
      %23 = vector.broadcast %cst_18 : f32 to vector<8x128xf32>
      %24 = arith.addf %23, %22 : vector<8x128xf32>
      %cst_19 = arith.constant 1.000000e+00 : f32
      %25 = vector.broadcast %cst_19 : f32 to vector<8x128xf32>
      %26 = arith.divf %25, %24 : vector<8x128xf32>
      %cst_20 = arith.constant 1.06140542 : f32
      %27 = vector.broadcast %cst_20 : f32 to vector<8x128xf32>
      %28 = arith.mulf %27, %26 : vector<8x128xf32>
      %cst_21 = arith.constant -1.45315206 : f32
      %29 = vector.broadcast %cst_21 : f32 to vector<8x128xf32>
      %30 = arith.addf %28, %29 : vector<8x128xf32>
      %31 = arith.mulf %30, %26 : vector<8x128xf32>
      %cst_22 = arith.constant 1.42141378 : f32
      %32 = vector.broadcast %cst_22 : f32 to vector<8x128xf32>
      %33 = arith.addf %31, %32 : vector<8x128xf32>
      %34 = arith.mulf %33, %26 : vector<8x128xf32>
      %cst_23 = arith.constant -0.284496725 : f32
      %35 = vector.broadcast %cst_23 : f32 to vector<8x128xf32>
      %36 = arith.addf %34, %35 : vector<8x128xf32>
      %37 = arith.mulf %36, %26 : vector<8x128xf32>
      %cst_24 = arith.constant 0.254829586 : f32
      %38 = vector.broadcast %cst_24 : f32 to vector<8x128xf32>
      %39 = arith.addf %37, %38 : vector<8x128xf32>
      %40 = arith.mulf %39, %26 : vector<8x128xf32>
      %41 = arith.mulf %20, %20 : vector<8x128xf32>
      %cst_25 = arith.constant 0.000000e+00 : f32
      %42 = vector.broadcast %cst_25 : f32 to vector<8x128xf32>
      %43 = arith.subf %42, %41 : vector<8x128xf32>
      %44 = math.exp %43 : vector<8x128xf32>
      %45 = arith.mulf %40, %44 : vector<8x128xf32>
      %cst_26 = arith.constant 1.000000e+00 : f32
      %46 = vector.broadcast %cst_26 : f32 to vector<8x128xf32>
      %47 = arith.subf %46, %45 : vector<8x128xf32>
      %cst_27 = arith.constant 0.000000e+00 : f32
      %48 = vector.broadcast %cst_27 : f32 to vector<8x128xf32>
      %49 = arith.cmpf olt, %19, %48 : vector<8x128xf32>
      %cst_28 = arith.constant 0.000000e+00 : f32
      %50 = vector.broadcast %cst_28 : f32 to vector<8x128xf32>
      %51 = arith.subf %50, %47 : vector<8x128xf32>
      %52 = arith.select %49, %51, %47 : vector<8x128xi1>, vector<8x128xf32>
      %cst_29 = arith.constant 1.000000e+00 : f32
      %53 = vector.broadcast %cst_29 : f32 to vector<8x128xf32>
      %54 = arith.addf %53, %52 : vector<8x128xf32>
      %55 = arith.mulf %17, %54 : vector<8x128xf32>
      %c0_30 = arith.constant 0 : index
      %c0_31 = arith.constant 0 : index
      %56 = vector.load %arg8[%c0_30, %c0_31] : memref<8x128xf32, #tpu.memory_space<vmem>>, vector<8x128xf32>
      tpu.vector_store %arg8[%c0_30, %c0_31], %55 {strides = array<i32>} : memref<8x128xf32, #tpu.memory_space<vmem>>, vector<8x128xf32>,
    } else {
    }
    %c0 = arith.constant 0 : index
    %c0_1 = arith.constant 0 : index
    %3 = vector.load %arg8[%c0, %c0_1] : memref<8x128xf32, #tpu.memory_space<vmem>>, vector<8x128xf32>
    %c0_2 = arith.constant 0 : index
    %c0_3 = arith.constant 0 : index
    %4 = vector.load %arg5[%c0_2, %c0_3] : memref<128x128xf32, #tpu.memory_space<vmem>>, vector<128x128xf32>
    %cst = arith.constant dense<0.000000e+00> : vector<8x128xf32>
    %5 = tpu.matmul %3, %4, %cst {dimension_numbers = #tpu.dot_dimension_numbers<[1], [0], [0], [1], [0, 0, 1, 1], [], []>} : vector<8x128xf32>, vector<128x128xf32>, vector<8x128xf32> -> vector<8x128xf32>
    %c0_4 = arith.constant 0 : index
    %c0_5 = arith.constant 0 : index
    %6 = vector.load %arg6[%c0_4, %c0_5] : memref<1x128xf32, #tpu.memory_space<vmem>>, vector<1x128xf32>
    %7 = vector.broadcast %6 : vector<1x128xf32> to vector<8x128xf32>
    %8 = arith.addf %5, %7 : vector<8x128xf32>
    %c0_6 = arith.constant 0 : index
    %c0_7 = arith.constant 0 : index
    %9 = vector.load %arg7[%c0_6, %c0_7] : memref<8x128xf32, #tpu.memory_space<vmem>>, vector<8x128xf32>
    tpu.vector_store %arg7[%c0_6, %c0_7], %8 {strides = array<i32>} : memref<8x128xf32, #tpu.memory_space<vmem>>, vector<8x128xf32>,
    return
  }
  func.func @transform_0(%arg0: i32, %arg1: i32) -> (i32, i32) {
    %c0_i32 = arith.constant 0 : i32
    %c0_i32_0 = arith.constant 0 : i32
    return %arg0, %c0_i32 : i32, i32
  }
  func.func @transform_1(%arg0: i32, %arg1: i32) -> (i32, i32) {
    %c0_i32 = arith.constant 0 : i32
    %c0_i32_0 = arith.constant 0 : i32
    %c0_i32_1 = arith.constant 0 : i32
    return %c0_i32, %c0_i32_0 : i32, i32
  }
  func.func @transform_2(%arg0: i32, %arg1: i32) -> (i32, i32) {
    %c0_i32 = arith.constant 0 : i32
    %c0_i32_0 = arith.constant 0 : i32
    %c0_i32_1 = arith.constant 0 : i32
    return %c0_i32, %c0_i32_0 : i32, i32
  }
  func.func @transform_3(%arg0: i32, %arg1: i32) -> (i32, i32) {
    %c0_i32 = arith.constant 0 : i32
    %c0_i32_0 = arith.constant 0 : i32
    %c0_i32_1 = arith.constant 0 : i32
    return %c0_i32, %c0_i32_0 : i32, i32
  }
  func.func @transform_4(%arg0: i32, %arg1: i32) -> (i32, i32) {
    %c0_i32 = arith.constant 0 : i32
    %c0_i32_0 = arith.constant 0 : i32
    %c0_i32_1 = arith.constant 0 : i32
    return %c0_i32, %c0_i32_0 : i32, i32
  }
  func.func @transform_5(%arg0: i32, %arg1: i32) -> (i32, i32) {
    %c0_i32 = arith.constant 0 : i32
    return %arg0, %arg1 : i32, i32
  }
}

</mosaic_0001>

<bundles_post_ra>
// kernel: audio_projector_prepadded.1
= control target key start
LH: loop header
LB: loop body
LE: loop exit
PB: predicated region body
PF: predicated region fallthrough
CT: control target
= control target key end

     0   :  { %10 = vsyncpa [#allocation4], 0  ;;  %s767_s0 = inlined_call_operand.vmem [shape: f32[16,128], index: 0, kind: input, shape index: {}]   ;;  %s768_s1 = inlined_call_operand.hbm [shape: f32[128,128], index: 1, kind: input, shape index: {}]   ;;  %s769_s2 = inlined_call_operand.vmem [shape: f32[1,128], index: 2, kind: input, shape index: {}]   ;;  %s770_s3 = inlined_call_operand.hbm [shape: f32[128,128], index: 3, kind: input, shape index: {}]   ;;  %s771_s4 = inlined_call_operand.vmem [shape: f32[1,128], index: 4, kind: input, shape index: {}]   ;;  %s772_s5 = inlined_call_operand.vmem [shape: f32[16,128], index: 5, kind: output, shape index: {}]  }
   0x1   :  { %11 = vsyncpa [#allocation6], 0  ;;  %s688_s18 = smov 0   ;;  %s690_s19 = smov 0  }
   0x2   :  { %s692_s20 = smov 0  }
   0x3 LB: > { %s496_s21 = sadd.s32 4294967295, %s652_s20   ;;  %s29_s22 = sadd.s32 1, %s648_s19  ;;  %s652_s20 = sphi %s692_s20, %s17_s20   ;;  %s648_s19 = sphi %s690_s19, %s776_s19   ;;  %s644_s18 = sphi %s688_s18, %s775_s18  }
   0x4   : > { %p31_p0 = scmp.ge.s32.totalorder %s29_s22, 2  ;;  %p498_p1 = scmp.ge.s32.totalorder %s652_s20, 1 }
   0x5   : > { %p172_p2 = scmp.lt.s32.totalorder %s652_s20, 3  ;;  %p713_p4 = scmp.eq.s32.totalorder %s496_s21, 0 }
   0x6   : > { %s778_s22 = smov (%p31_p0, %s29_s22), 0  ;;  %s183_s27 = sshll.u32 %s768_s1, 4  ;;  %s184_s27 = int_to_ptr.hbm [resolvable:$true] %s183_s27 }
   0x7   : > { %p709_p3 = pnand %p498_p1, %p172_p2  ;;  %s654_s28 = smov [#allocation3]  }
   0x8   : > { %s185_s29 = sshll.u32 %s654_s28, 4  ;;  %s200_s7 = sshll.u32 %s770_s3, 4  ;;  %s186_s29 = int_to_ptr.vmem [resolvable:$true] %s185_s29  ;;  %s201_s7 = int_to_ptr.hbm [resolvable:$true] %s200_s7 }
   0x9   : > { %p517_p5 = pneg %p709_p3  ;;  %s655_s8 = smov 128  }
   0xa   : > { %s656_s9 = smov 8   ;;  %s657_s10 = smov [#allocation5]  }
   0xb   : > { %p518_p6 = pnand %p713_p4, %p517_p5  ;;  %s202_s11 = sshll.u32 %s657_s10, 4  ;;  %s203_s11 = int_to_ptr.vmem [resolvable:$true] %s202_s11 }
   0xc   : > { %228 = sbr.rel (%p709_p3) target bundleno = 363 (0x16b), region = 40 }
   0xd   : > { %520 = dma.hbm_to_vmem [thread:$0]  (!%p518_p6), %s184_s27, 2048, %s186_s29, [#allocation4], %s655_s8, %s655_s8, %s656_s9  }
   0xe   : > { %523 = dma.hbm_to_vmem [thread:$0]  (!%p518_p6), %s201_s7, 2048, %s203_s11, [#allocation6], %s655_s8, %s655_s8, %s656_s9  }
  0x11   : > { %635 = dma.done.wait (%p713_p4), [#allocation4], 2048  }
  0x12   : > { %637 = vsyncadd (%p713_p4), [#allocation4], 4294965248 }
  0x13   : > { %639 = dma.done.wait (%p713_p4), [#allocation6], 2048  }
  0x14   : > { %641 = vsyncadd (%p713_p4), [#allocation6], 4294965248  ;;  %v294_v0 = vld [vmem:[#allocation3 + $0x78] sm:$0xff]  ;;  %v293_v1 = vld [vmem:[#allocation3 + $0x70] sm:$0xff]  ;;  %p263_p7 = scmp.lt.s32.totalorder %s644_s18, 1 }
  0x15   : > { %299 = vmatpush.msra.mxu0 %v294_v0  ;;  %v292_v2 = vld [vmem:[#allocation3 + $0x68] sm:$0xff]  ;;  %v291_v3 = vld [vmem:[#allocation3 + $0x60] sm:$0xff]  ;;  %v290_v4 = vld [vmem:[#allocation3 + $0x58] sm:$0xff] }
  0x16   : > { %v289_v5 = vld [vmem:[#allocation3 + $0x50] sm:$0xff]  ;;  %v288_v6 = vld [vmem:[#allocation3 + $0x48] sm:$0xff]  ;;  %v287_v7 = vld [vmem:[#allocation3 + $0x40] sm:$0xff]  ;;  %s780_s18 = smov (!%p263_p7, %s644_s18), 1 }
  0x17   : > { %300 = vmatpush.msra.mxu0 %v293_v1  ;;  %v286_v8 = vld [vmem:[#allocation3 + $0x38] sm:$0xff]  ;;  %v285_v9 = vld [vmem:[#allocation3 + $0x30] sm:$0xff]  ;;  %v284_v10 = vld [vmem:[#allocation3 + $0x28] sm:$0xff]  ;;  %s505_s12 = sshll.u32 %s780_s18, 3 }
  0x18   : > { %v283_v11 = vld [vmem:[#allocation3 + $0x20] sm:$0xff]  ;;  %v282_v12 = vld [vmem:[#allocation3 + $0x18] sm:$0xff]  ;;  %v281_v13 = vld [vmem:[#allocation3 + $0x10] sm:$0xff]  ;;  %s266_s15 = scalar_lea.vmem %s767_s0, %s505_s12  ;;  %s273_s26 = scalar_lea.vmem %s772_s5, %s505_s12 }
  0x19   : > { %301 = vmatpush.msra.mxu0 %v292_v2  ;;  %v280_v14 = vld [vmem:[#allocation3 + $0x8] sm:$0xff]  ;;  %v279_v15 = vld [vmem:[#allocation3] sm:$0xff]  ;;  %v376_v17 = vld [vmem:[#allocation5 + $0x78] sm:$0xff] }
  0x1a   : > { %v278_v16 = vld [vmem:[%s266_s15] sm:$0xff]  ;;  %v375_v18 = vld [vmem:[#allocation5 + $0x70] sm:$0xff]  ;;  %381 = vmatpush.msra.mxu1 %v376_v17  ;;  %v374_v19 = vld [vmem:[#allocation5 + $0x68] sm:$0xff] }
  0x1b   : > { %302 = vmatpush.msra.mxu0 %v291_v3  ;;  %v373_v20 = vld [vmem:[#allocation5 + $0x60] sm:$0xff]  ;;  %v372_v21 = vld [vmem:[#allocation5 + $0x58] sm:$0xff]  ;;  %v371_v23 = vld [vmem:[#allocation5 + $0x50] sm:$0xff] }
  0x1c   : > { %382 = vmatpush.msra.mxu1 %v375_v18  ;;  %v556_v22 = vld [vmem:[%s769_s2] ss:$0 sm:$0xff]  ;;  %v370_v25 = vld [vmem:[#allocation5 + $0x48] sm:$0xff]  ;;  %v368_v29 = vld [vmem:[#allocation5 + $0x38] sm:$0xff] }
  0x1d   : > { %303 = vmatpush.msra.mxu0 %v290_v4  ;;  %v369_v27 = vld [vmem:[#allocation5 + $0x40] sm:$0xff]  ;;  %v367_v31 = vld [vmem:[#allocation5 + $0x30] sm:$0xff]  ;;  %v366_v33 = vld [vmem:[#allocation5 + $0x28] sm:$0xff] }
  0x1e   : > { %383 = vmatpush.msra.mxu1 %v374_v19  ;;  %v365_v35 = vld [vmem:[#allocation5 + $0x20] sm:$0xff]  ;;  %v364_v36 = vld [vmem:[#allocation5 + $0x18] sm:$0xff]  ;;  %v363_v37 = vld [vmem:[#allocation5 + $0x10] sm:$0xff] }
  0x1f   : > { %304 = vmatpush.msra.mxu0 %v289_v5  ;;  %v362_v38 = vld [vmem:[#allocation5 + $0x8] sm:$0xff]  ;;  %v361_v41 = vld [vmem:[#allocation5] sm:$0xff] }
  0x20   : > { %384 = vmatpush.msra.mxu1 %v373_v20 }
  0x21   : > { %305 = vmatpush.msra.mxu0 %v288_v6  ;;  %v557_v6 = vld [vmem:[%s771_s4] ss:$0 sm:$0xff] }
  0x22   : > { %385 = vmatpush.msra.mxu1 %v372_v21 }
  0x23   : > { %306 = vmatpush.msra.mxu0 %v287_v7 }
  0x24   : > { %386 = vmatpush.msra.mxu1 %v371_v23 }
  0x25   : > { %307 = vmatpush.msra.mxu0 %v286_v8 }
  0x26   : > { %387 = vmatpush.msra.mxu1 %v370_v25 }
  0x27   : > { %308 = vmatpush.msra.mxu0 %v285_v9 }
  0x28   : > { %388 = vmatpush.msra.mxu1 %v369_v27 }
  0x29   : > { %309 = vmatpush.msra.mxu0 %v284_v10 }
  0x2a   : > { %389 = vmatpush.msra.mxu1 %v368_v29 }
  0x2b   : > { %310 = vmatpush.msra.mxu0 %v283_v11 }
  0x2c   : > { %390 = vmatpush.msra.mxu1 %v367_v31 }
  0x2d   : > { %311 = vmatpush.msra.mxu0 %v282_v12 }
  0x2e   : > { %391 = vmatpush.msra.mxu1 %v366_v33 }
  0x2f   : > { %312 = vmatpush.msra.mxu0 %v281_v13 }
  0x30   : > { %392 = vmatpush.msra.mxu1 %v365_v35 }
  0x31   : > { %313 = vmatpush.msra.mxu0 %v280_v14 }
  0x32   : > { %393 = vmatpush.msra.mxu1 %v364_v36 }
  0x33   : > { %314 = vmatpush.msra.mxu0 %v279_v15 }
  0x34   : > { %315 = vmatmul.f32.vlgmr.msra.gmra.mxu0 %v278_v16  ;;  %394 = vmatpush.msra.mxu1 %v363_v37 }
  0x36   : > { %395 = vmatpush.msra.mxu1 %v362_v38 }
  0x38   : > { %396 = vmatpush.msra.mxu1 %v361_v41 }
  0xb1   : > { %v316_v24 = vpop.f32.mrf.mxu0 }
  0xb2   : > { %v317_v26 = vadd.f32 %v556_v22, %v316_v24 }
  0xb4   : > { %v320_v28 = vmul.f32 0.70710677, %v317_v26  ;;  %v319_v3 = vmul.f32 0.5, %v317_v26 }
  0xb6   : > { %v321_v30 = vand.u32 2147483647, %v320_v28  ;;  %vm354_vm4 = vcmp.lt.f32.partialorder %v320_v28, 0.0 }
  0xb8   : > { %v322_v32 = vmul.f32 0.3275911, %v321_v30  ;;  %v348_v49 = vmul.f32 %v321_v30, %v321_v30 }
  0xba   : > { %v323_v34 = vadd.f32 1.0, %v322_v32  ;;  %v349_v53 = vsub.f32 0.0, %v348_v49 }
  0xbc   : > { %558 = vrcp.f32 %v323_v34  ;;  %v335_v43 = vand.u32 2147483648, %v323_v34  ;;  %v333_v45 = vand.u32 2147483647, %v323_v34  ;;  %vm329_vm1 = vweird.f32 %v323_v34 }
  0xbd   : > { %v350_v56 = vmul.f32 1.442695, %v349_v53 }
  0xbe   : > { %v336_v47 = vor.u32 1.1754944e-38, %v335_v43  ;;  %vm334_vm3 = vcmp.eq.f32.partialorder %v333_v45, 8.507059e+37 }
  0xbf   : > { %560 = vpow2.f32 %v350_v56 }
  0xc2   : > { %v559_v39 = vpop.eup %558 }
  0xc3   : > { %v325_v40 = vmul.f32 %v559_v39, %v323_v34  ;;  %vm330_vm0 = vweird.f32 %v559_v39 }
  0xc4   : > { %vm331_vm2 = vmor %vm329_vm1, %vm330_vm0 }
  0xc5   : > { %v326_v42 = vsub.f32 1.0, %v325_v40  ;;  %v561_v62 = vpop.eup %560 }
  0xc7   : > { %v327_v44 = vmul.f32 %v559_v39, %v326_v42 }
  0xc9   : > { %v328_v46 = vadd.f32 %v559_v39, %v327_v44 }
  0xcb   : > { %v332_v48 = vsel %vm331_vm2, %v559_v39, %v328_v46 }
  0xcc   : > { %v337_v50 = vsel %vm334_vm3, %v336_v47, %v332_v48 }
  0xcd   : > { %v339_v51 = vmul.f32 1.0614054, %v337_v50 }
  0xcf   : > { %v340_v52 = vadd.f32 -1.4531521, %v339_v51 }
  0xd1   : > { %v341_v54 = vmul.f32 %v340_v52, %v337_v50 }
  0xd3   : > { %v342_v55 = vadd.f32 1.4214138, %v341_v54 }
  0xd5   : > { %v343_v57 = vmul.f32 %v342_v55, %v337_v50 }
  0xd7   : > { %v344_v58 = vadd.f32 -0.28449672, %v343_v57 }
  0xd9   : > { %v345_v59 = vmul.f32 %v344_v58, %v337_v50 }
  0xdb   : > { %v346_v60 = vadd.f32 0.2548296, %v345_v59 }
  0xdd   : > { %v347_v61 = vmul.f32 %v346_v60, %v337_v50 }
  0xdf   : > { %v352_v63 = vmul.f32 %v561_v62, %v347_v61 }
  0xe1   : > { %v353_v0 = vsub.f32 1.0, %v352_v63 }
  0xe3   : > { %v355_v1 = vsub.f32 0.0, %v353_v0 }
  0xe5   : > { %v356_v2 = vsel %vm354_vm4, %v355_v1, %v353_v0 }
  0xe6   : > { %v357_v4 = vadd.f32 1.0, %v356_v2 }
  0xe8   : > { %v358_v5 = vmul.f32 %v357_v4, %v319_v3 }
  0xea   : > { %397 = vmatmul.f32.vlgmr.msra.gmra.mxu1 %v358_v5 }
 0x167   : > { %v398_v7 = vpop.f32.mrf.mxu1 }
 0x168   : > { %v399_v8 = vadd.f32 %v557_v6, %v398_v7 }
 0x16a   : > { %401 = vst [vmem:[%s273_s26] sm:$0xff] %v399_v8 }
 0x16b PF: > { %s17_s20 = sadd.s32 1, %s652_s20   ;;  %s775_s18 = smov %s648_s19 }
 0x16c   : > { %p14_p8 = scmp.ge.s32.totalorder %s17_s20, 4   ;;  %s776_s19 = smov %s778_s22 }
 0x16e   :  { %16 = sbr.rel (!%p14_p8) target bundleno = 3 (0x3), region = 83 }
 0x173   :  { %427 = vsyncpa [#allocation4], 1 }
 0x174   :  { %429 = vsyncpa [#allocation4 + $0x1], 1 }
 0x175   :  { %430 = vsyncpa [#allocation6], 1 }

</bundles_post_ra>
